<compile_context>
chip_gen: v6e
topology: v6e:2x2x1
jax: 0.10.0
libtpu: 0.0.40
codegen_flags: <defaults>
</compile_context>

<pallas_src>
import math

import jax
import jax.numpy as jnp
from jax import lax
from jax.experimental import pallas as pl
from jax.experimental.pallas import tpu as pltpu


def _se_kernel(x_ref, wd_ref, bd_ref, wu_ref, bu_ref, o_ref):
    # x_ref:  (TB, C, L) in the activation's native dtype
    # wd_ref: (C, H)  down-projection weight (torch W_down.T), f32
    # bd_ref: (1, H)
    # wu_ref: (H, C)  up-projection weight (torch W_up.T), f32
    # bu_ref: (1, C)
    # o_ref:  (TB, C, L)
    x = x_ref[...]                                                      # native dtype

    # squeeze: adaptive_avg_pool1d(output_size=1) == mean over L (f32 accumulation)
    pooled = jnp.mean(x.astype(jnp.float32), axis=-1)                   # (TB, C)

    # down linear + exact (erf) GELU, matching torch nn.GELU default
    h = jnp.dot(pooled, wd_ref[...],
                preferred_element_type=jnp.float32) + bd_ref[...]       # (TB, H)
    h = 0.5 * h * (1.0 + lax.erf(h * (1.0 / math.sqrt(2.0))))

    # up linear + sigmoid, all in f32
    s = jnp.dot(h, wu_ref[...],
                preferred_element_type=jnp.float32) + bu_ref[...]       # (TB, C)
    s = jax.nn.sigmoid(s)

    # excite: single cast of the f32 scale to the activation dtype, multiply in that
    # dtype (bf16 multiply on v6e/v7x; unchanged f32 path for f32 activations).
    s = s.astype(x.dtype)
    o_ref[...] = (x * s[:, :, None]).astype(o_ref.dtype)


def _pick_batch_tile(B, C, L, itemsize, target_bytes):
    """Largest divisor of B whose (TB, C, L) block fits `target_bytes`, preferring a
    grid of >= 2 steps so the parallel batch axis can shard across TensorCores (v7x)."""
    divisors = [d for d in range(1, B + 1) if B % d == 0]
    fitting = [d for d in divisors if d * C * L * itemsize <= target_bytes]
    if not fitting:
        return 1
    multi = [d for d in fitting if B // d >= 2]
    return max(multi) if multi else max(fitting)


def layer_se_forward(inputs, w_down, b_down, w_up, b_up, *, target_block_bytes=4 << 20):
    """inputs: (B, C, L).  w_down: (H, C), b_down: (H,), w_up: (C, H), b_up: (C,)
    (torch nn.Linear layout: weight is (out_features, in_features))."""
    B, C, L = inputs.shape
    H = w_down.shape[0]
    itemsize = jnp.dtype(inputs.dtype).itemsize

    # Parameters are tiny; keep them in f32 (MXU accumulates in f32 anyway).
    wd_t = jnp.asarray(w_down, jnp.float32).T            # (C, H)
    wu_t = jnp.asarray(w_up, jnp.float32).T              # (H, C)
    bd = jnp.asarray(b_down, jnp.float32).reshape(1, H)
    bu = jnp.asarray(b_up, jnp.float32).reshape(1, C)

    # Batch TB rows per grid step (amortize per-step overhead, fill the MXU M dim).
    tb = _pick_batch_tile(B, C, L, itemsize, target_block_bytes)
    grid = (B // tb,)

    block_bytes = tb * C * L * itemsize
    weight_bytes = (wd_t.size + wu_t.size + bd.size + bu.size) * 4
    # double-buffered input + output, plus f32 temporaries used by the pooled mean.
    vmem_needed = 4 * block_bytes + 2 * tb * C * L * 4 + 2 * weight_bytes + (4 << 20)
    vmem_limit = int(min(100 << 20, max(32 << 20, vmem_needed)))

    grid_spec = pltpu.PrefetchScalarGridSpec(
        num_scalar_prefetch=0,
        grid=grid,
        in_specs=[
            pl.BlockSpec((tb, C, L), lambda b: (b, 0, 0)),   # TB batch rows per step
            # Constant index_map -> same block every step; Pallas keeps these resident
            # in VMEM instead of re-DMA'ing the tiny weights each iteration.
            pl.BlockSpec((C, H), lambda b: (0, 0)),
            pl.BlockSpec((1, H), lambda b: (0, 0)),
            pl.BlockSpec((H, C), lambda b: (0, 0)),
            pl.BlockSpec((1, C), lambda b: (0, 0)),
        ],
        out_specs=pl.BlockSpec((tb, C, L), lambda b: (b, 0, 0)),
    )
    # NOTE: for best store throughput at production shapes L (the lane dim) should be a
    # multiple of 128; full-extent blocks keep small L legal here.

    return pl.pallas_call(
        _se_kernel,
        out_shape=jax.ShapeDtypeStruct((B, C, L), inputs.dtype),
        grid_spec=grid_spec,
        compiler_params=pltpu.CompilerParams(
            dimension_semantics=("parallel",),
            vmem_limit_bytes=vmem_limit),
    )(inputs, wd_t, bd, wu_t, bu)          # <- inputs stay in their native dtype


def _reference(inputs, w_down, b_down, w_up, b_up):
    # pure-JAX reference mirroring the PyTorch forward (f32 math)
    x32 = inputs.astype(jnp.float32)
    pooled = jnp.mean(x32, axis=-1)                                      # (B, C)
    h = pooled @ w_down.T + b_down                                       # (B, H)
    h = 0.5 * h * (1.0 + lax.erf(h / jnp.sqrt(2.0)))
    s = jax.nn.sigmoid(h @ w_up.T + b_up)                                # (B, C)
    return (x32 * s[:, :, None]).astype(inputs.dtype)


if __name__ == "__main__":
    B, C, L = 2, 4, 16          # batch, input_channels, sequence length
    H = 8                       # internal_neurons

    key = jax.random.PRNGKey(0)
    k_x, k_wd, k_bd, k_wu, k_bu = jax.random.split(key, 5)

    x = jax.random.normal(k_x, (B, C, L), dtype=jnp.float32)
    # deterministic "init" mimicking nn.Linear parameter shapes
    w_down = jax.random.normal(k_wd, (H, C), dtype=jnp.float32) * (1.0 / math.sqrt(C))
    b_down = jax.random.normal(k_bd, (H,), dtype=jnp.float32) * 0.1
    w_up = jax.random.normal(k_wu, (C, H), dtype=jnp.float32) * (1.0 / math.sqrt(H))
    b_up = jax.random.normal(k_bu, (C,), dtype=jnp.float32) * 0.1

    # f32 activations (exact against reference)
    out = jax.block_until_ready(layer_se_forward(x, w_down, b_down, w_up, b_up))
    ref = _reference(x, w_down, b_down, w_up, b_up)
    assert out.shape == (B, C, L)
    assert out.dtype == x.dtype
    assert jnp.allclose(out, ref, atol=1e-5, rtol=1e-5), "f32 mismatch vs reference"

    # bf16 activations: exercises the native-dtype path (bf16 HBM I/O + bf16 excite multiply)
    x_bf16 = x.astype(jnp.bfloat16)
    out_bf16 = jax.block_until_ready(layer_se_forward(x_bf16, w_down, b_down, w_up, b_up))
    ref_bf16 = _reference(x_bf16, w_down, b_down, w_up, b_up)
    assert out_bf16.dtype == jnp.bfloat16
    assert jnp.allclose(out_bf16.astype(jnp.float32), ref_bf16.astype(jnp.float32),
                        atol=3e-2, rtol=3e-2), "bf16 mismatch vs reference"

    print("KERNEL_OK")
</pallas_src>

<mosaic_0001>
module attributes {stable_mosaic.version = 11 : i64} {
  func.func @_se_kernel(%arg0: i32, %arg1: memref<1x4x16xf32, #tpu.memory_space<vmem>>, %arg2: memref<4x8xf32, #tpu.memory_space<vmem>>, %arg3: memref<1x8xf32, #tpu.memory_space<vmem>>, %arg4: memref<8x4xf32, #tpu.memory_space<vmem>>, %arg5: memref<1x4xf32, #tpu.memory_space<vmem>>, %arg6: memref<1x4x16xf32, #tpu.memory_space<vmem>>) attributes {dimension_semantics = [#tpu.dimension_semantics<parallel>], iteration_bounds = array<i64: 2>, scalar_prefetch = 0 : i64, scratch_operands = 0 : i64, tpu.core_type = #tpu.core_type<tc>, window_params = [{transform_indices = @transform_0, window_bounds = array<i64: 1, 4, 16>}, {pipeline_mode = #tpu.pipeline_mode<synchronous>, transform_indices = @transform_1, window_bounds = array<i64: 4, 8>}, {pipeline_mode = #tpu.pipeline_mode<synchronous>, transform_indices = @transform_2, window_bounds = array<i64: 1, 8>}, {pipeline_mode = #tpu.pipeline_mode<synchronous>, transform_indices = @transform_3, window_bounds = array<i64: 8, 4>}, {pipeline_mode = #tpu.pipeline_mode<synchronous>, transform_indices = @transform_4, window_bounds = array<i64: 1, 4>}, {transform_indices = @transform_5, window_bounds = array<i64: 1, 4, 16>}]} {
    %c0 = arith.constant 0 : index
    %c0_0 = arith.constant 0 : index
    %c0_1 = arith.constant 0 : index
    %0 = vector.load %arg1[%c0, %c0_0, %c0_1] : memref<1x4x16xf32, #tpu.memory_space<vmem>>, vector<1x4x16xf32>
    %cst = arith.constant dense<0.000000e+00> : vector<1x4xf32>
    %1 = vector.multi_reduction <add>, %0, %cst [2] : vector<1x4x16xf32> to vector<1x4xf32>
    %cst_2 = arith.constant 1.600000e+01 : f32
    %2 = vector.broadcast %cst_2 : f32 to vector<1x4xf32>
    %3 = arith.divf %1, %2 : vector<1x4xf32>
    %c0_3 = arith.constant 0 : index
    %c0_4 = arith.constant 0 : index
    %4 = vector.load %arg2[%c0_3, %c0_4] : memref<4x8xf32, #tpu.memory_space<vmem>>, vector<4x8xf32>
    %cst_5 = arith.constant dense<0.000000e+00> : vector<1x8xf32>
    %5 = tpu.matmul %3, %4, %cst_5 {dimension_numbers = #tpu.dot_dimension_numbers<[1], [0], [0], [1], [0, 0, 1, 1], [], []>} : vector<1x4xf32>, vector<4x8xf32>, vector<1x8xf32> -> vector<1x8xf32>
    %c0_6 = arith.constant 0 : index
    %c0_7 = arith.constant 0 : index
    %6 = vector.load %arg3[%c0_6, %c0_7] : memref<1x8xf32, #tpu.memory_space<vmem>>, vector<1x8xf32>
    %7 = arith.addf %5, %6 : vector<1x8xf32>
    %cst_8 = arith.constant 5.000000e-01 : f32
    %8 = vector.broadcast %cst_8 : f32 to vector<1x8xf32>
    %9 = arith.mulf %8, %7 : vector<1x8xf32>
    %cst_9 = arith.constant 0.707106769 : f32
    %10 = vector.broadcast %cst_9 : f32 to vector<1x8xf32>
    %11 = arith.mulf %7, %10 : vector<1x8xf32>
    %12 = math.erf %11 : vector<1x8xf32>
    %cst_10 = arith.constant 1.000000e+00 : f32
    %13 = vector.broadcast %cst_10 : f32 to vector<1x8xf32>
    %14 = arith.addf %13, %12 : vector<1x8xf32>
    %15 = arith.mulf %9, %14 : vector<1x8xf32>
    %c0_11 = arith.constant 0 : index
    %c0_12 = arith.constant 0 : index
    %16 = vector.load %arg4[%c0_11, %c0_12] : memref<8x4xf32, #tpu.memory_space<vmem>>, vector<8x4xf32>
    %cst_13 = arith.constant dense<0.000000e+00> : vector<1x4xf32>
    %17 = tpu.matmul %15, %16, %cst_13 {dimension_numbers = #tpu.dot_dimension_numbers<[1], [0], [0], [1], [0, 0, 1, 1], [], []>} : vector<1x8xf32>, vector<8x4xf32>, vector<1x4xf32> -> vector<1x4xf32>
    %c0_14 = arith.constant 0 : index
    %c0_15 = arith.constant 0 : index
    %18 = vector.load %arg5[%c0_14, %c0_15] : memref<1x4xf32, #tpu.memory_space<vmem>>, vector<1x4xf32>
    %19 = arith.addf %17, %18 : vector<1x4xf32>
    %20 = arith.negf %19 : vector<1x4xf32>
    %21 = math.exp %20 : vector<1x4xf32>
    %cst_16 = arith.constant 1.000000e+00 : f32
    %22 = vector.broadcast %cst_16 : f32 to vector<1x4xf32>
    %23 = arith.addf %22, %21 : vector<1x4xf32>
    %24 = arith.divf %22, %23 : vector<1x4xf32>
    %25 = vector.shape_cast %24 : vector<1x4xf32> to vector<1x4x1xf32>
    %26 = vector.broadcast %25 : vector<1x4x1xf32> to vector<1x4x16xf32>
    %27 = arith.mulf %0, %26 : vector<1x4x16xf32>
    %c0_17 = arith.constant 0 : index
    %c0_18 = arith.constant 0 : index
    %c0_19 = arith.constant 0 : index
    %28 = vector.load %arg6[%c0_17, %c0_18, %c0_19] : memref<1x4x16xf32, #tpu.memory_space<vmem>>, vector<1x4x16xf32>
    tpu.vector_store %arg6[%c0_17, %c0_18, %c0_19], %27 {strides = array<i32>} : memref<1x4x16xf32, #tpu.memory_space<vmem>>, vector<1x4x16xf32>,
    return
  }
  func.func @transform_0(%arg0: i32) -> (i32, i32, i32) {
    %c0_i32 = arith.constant 0 : i32
    %c0_i32_0 = arith.constant 0 : i32
    %c0_i32_1 = arith.constant 0 : i32
    return %arg0, %c0_i32, %c0_i32_0 : i32, i32, i32
  }
  func.func @transform_1(%arg0: i32) -> (i32, i32) {
    %c0_i32 = arith.constant 0 : i32
    %c0_i32_0 = arith.constant 0 : i32
    %c0_i32_1 = arith.constant 0 : i32
    return %c0_i32, %c0_i32_0 : i32, i32
  }
  func.func @transform_2(%arg0: i32) -> (i32, i32) {
    %c0_i32 = arith.constant 0 : i32
    %c0_i32_0 = arith.constant 0 : i32
    %c0_i32_1 = arith.constant 0 : i32
    return %c0_i32, %c0_i32_0 : i32, i32
  }
  func.func @transform_3(%arg0: i32) -> (i32, i32) {
    %c0_i32 = arith.constant 0 : i32
    %c0_i32_0 = arith.constant 0 : i32
    %c0_i32_1 = arith.constant 0 : i32
    return %c0_i32, %c0_i32_0 : i32, i32
  }
  func.func @transform_4(%arg0: i32) -> (i32, i32) {
    %c0_i32 = arith.constant 0 : i32
    %c0_i32_0 = arith.constant 0 : i32
    %c0_i32_1 = arith.constant 0 : i32
    return %c0_i32, %c0_i32_0 : i32, i32
  }
  func.func @transform_5(%arg0: i32) -> (i32, i32, i32) {
    %c0_i32 = arith.constant 0 : i32
    %c0_i32_0 = arith.constant 0 : i32
    %c0_i32_1 = arith.constant 0 : i32
    return %arg0, %c0_i32, %c0_i32_0 : i32, i32, i32
  }
}

</mosaic_0001>

<bundles_post_ra>
// kernel: tpu_custom_call.1
= control target key start
LH: loop header
LB: loop body
LE: loop exit
PB: predicated region body
PF: predicated region fallthrough
CT: control target
= control target key end

     0   :  { %10 = vsyncpa [#allocation3], 0  ;;  %s753_s0 = inlined_call_operand.vmem [shape: f32[2,4,16], index: 0, kind: input, shape index: {}]   ;;  %s754_s1 = inlined_call_operand.vmem [shape: f32[4,8], index: 1, kind: input, shape index: {}]   ;;  %s755_s2 = inlined_call_operand.vmem [shape: f32[1,8], index: 2, kind: input, shape index: {}]   ;;  %s756_s3 = inlined_call_operand.vmem [shape: f32[8,4], index: 3, kind: input, shape index: {}]   ;;  %s757_s4 = inlined_call_operand.vmem [shape: f32[1,4], index: 4, kind: input, shape index: {}]   ;;  %s758_s5 = inlined_call_operand.hbm [shape: f32[2,4,16], index: 5, kind: output, shape index: {}]  }
   0x1   :  { %12 = vsyncpa [#allocation3 + $0x1], 0  ;;  %s652_s18 = smov 0   ;;  %s654_s19 = smov 0  }
   0x2   :  { %s656_s20 = smov 0   ;;  %s658_s21 = smov 0  }
   0x3 LB: > { %s673_s22 = sadd.s32 4294967295, %s617_s21   ;;  %s482_s23 = sadd.s32 4294967294, %s617_s21   ;;  %s617_s21 = sphi %s658_s21, %s764_s21   ;;  %s613_s20 = sphi %s656_s20, %s763_s20   ;;  %s609_s19 = sphi %s654_s19, %s762_s19   ;;  %s605_s18 = sphi %s652_s18, %s761_s18  }
   0x4   : > { %s677_s24 = sadd.s32 1, %s617_s21   ;;  %s135_s25 = sadd.s32 1, %s613_s20 }
   0x5   : > { %s132_s26 = ssub.s32 %s617_s21, %s677_s24  ;;  %p145_p0 = scmp.ne.s32.totalorder %s613_s20, %s609_s19 }
   0x6   : > { %p133_p1 = scmp.eq.s32.totalorder %s132_s26, 0  ;;  %p146_p2 = scmp.eq.s32.totalorder %s673_s22, 1 }
   0x7   : > { %p151_p3 = scmp.ne.s32.totalorder %s609_s19, %s605_s18  ;;  %p152_p4 = scmp.eq.s32.totalorder %s482_s23, 1 }
   0x8   : > { %s688_s27 = scalar_select %p133_p1, %s613_s20, %s135_s25  }
   0x9   : > { %p690_p5 = por %p146_p2, %p145_p0  ;;  %p694_p6 = por %p152_p4, %p151_p3 }
   0xa   : > { %p485_p7 = scmp.ge.s32.totalorder %s617_s21, 1  ;;  %p189_p8 = scmp.lt.s32.totalorder %s617_s21, 3 }
   0xc   : > { %p190_p9 = pnand %p485_p7, %p189_p8 }
   0xd   : > { %p216_p10 = scmp.lt.s32.totalorder (!%p190_p9), %s673_s22, 1  ;;  %s213_s23 = sand.u32 (!%p190_p9), 1, %s609_s19  }
   0xe   : > { %193 = sbr.rel (%p190_p9) target bundleno = 741 (0x2e5), region = 40  ;;  %s486_s25 = sshll.u32 (!%p190_p9), %s213_s23, 2 }
   0xf   : > { %s493_s26 = sshll.u32 (!%p190_p9), %s673_s22, 6  ;;  %s410_s10 = scalar_lea.sflag (!%p190_p9), [#allocation3], %s213_s23 }
  0x10   : > { %s621_s12 = smov (!%p190_p9), [#allocation2]  }
  0x11   : > { %s561_s13 = sshll.u32 (!%p190_p9), %s621_s12, 4  ;;  %s562_s13 = int_to_ptr.vmem [resolvable:$false] %s561_s13 }
  0x13   : > { %s217_s30 = scalar_select %p216_p10, %s673_s22, 1  ;;  %vm221_vm0 = vcmask 125952   ;;  %v619_v2 = vmov 0.0   ;;  %v227_v3 = vld [vmem:[%s754_s1] sm:$0xf]  ;;  %vm239_vm1 = vcmask 1043456   ;;  %v230_v4 = vlaneseq }
  0x14   : > { %500 = vmatprep.subr.mxu0 %v619_v2  ;;  %505 = vmatprep.subr.mxu1 %v619_v2  ;;  %vm620_vm2 = vmmov 0   ;;  %vm236_vm3 = vcmask 31744   ;;  %v318_v11 = vld [vmem:[%s756_s3] sm:$0xff]  ;;  %vm320_vm4 = vcmask 64512   ;;  %s563_s22 = scalar_lea.vmem %s562_s13, 128 }
  0x15   : > { %s487_s6 = sshll.u32 %s217_s30, 2  ;;  %501 = vmatpush3.msk.msra.mxu0 %vm239_vm1, %v227_v3  ;;  %502 = vmatprep.mubr.msk.f32.mxu0 %vm620_vm2, %v619_v2  ;;  %v231_v5 = vand.u32 127, %v230_v4  ;;  %v233_v6 = vshrl.u32 %v230_v4, 7  ;;  %v228_v12 = vld [vmem:[%s755_s2] sm:$0x1]  ;;  %s215_s30 = scalar_lea.vmem [#allocation2], %s486_s25 }
  0x16   : > { %s219_s9 = scalar_lea.vmem %s753_s0, %s487_s6  ;;  %507 = vmatprep.mubr.msk.f32.mxu1 %vm620_vm2, %v619_v2  ;;  %506 = vmatpush3.msra.mxu1 %v318_v11  ;;  %v319_v21 = vld [vmem:[%s757_s4] sm:$0x1]  ;;  %s423_s6 = sshll.u32 %s215_s30, 4  ;;  %s424_s6 = int_to_ptr.vmem [resolvable:$true] %s423_s6 }
  0x17   : > { %v220_v0 = vld [vmem:[%s219_s9] sm:$0xf]  ;;  %v234_v7 = vsub.s32 %v231_v5, %v233_v6  ;;  %v402_v28 = vsub.s32 0, %v233_v6  ;;  %s421_s9 = scalar_lea.hbm %s758_s5, %s493_s26  ;;  %s557_s11 = scalar_lea.vmem %s424_s6, 64 }
  0x18   : > { %v222_v1 = vsel %vm221_vm0, %v220_v0, 0.0  ;;  %p558_p11 = scmp.ne.s32.totalorder %s424_s6, %s557_s11  ;;  %p564_p0 = scmp.lt.s32.totalorder %s424_s6, %s562_s13 }
  0x19   : > { %223 = vadd.xlane.f32.xlu0 %v222_v1  ;;  %p565_p1 = scmp.lt.s32.totalorder %s563_s22, %s557_s11 }
  0x1a   : > { %p559_p12 = pnand %p558_p11, %p690_p5 }
  0x1b   : > { %p566_p2 = por %p565_p1, %p564_p0 }
  0x1c   : > { %p560_p13 = pneg %p559_p12 }
  0x1e   : > { %p567_p3 = pnand %p566_p2, %p560_p13 }
  0xa2   : > { %v224_v8 = vpop.xlane.xlu0 %223 }
  0xa3   : > { %v226_v9 = vmul.f32 0.0625, %v224_v8 }
  0xa5   : > { %v235_v10 = vrot.slane %v226_v9, %v234_v7 }
  0xa7   : > { %503 = vmatmul.mubr.msk.f32.vlgmr.msra.gmra.mxu0 %vm236_vm3, %v235_v10 }
 0x167   : > { %v309_v13 = vpop.f32.mrf.mxu0 }
 0x168   : > { %v310_v14 = vadd.f32 %v309_v13, %v228_v12 }
 0x169   : > { %v504_v15 = vpop.f32.mrf.mxu0 }
 0x16a   : > { %v314_v16 = vmul.f32 0.70710677, %v310_v14  ;;  %v313_v18 = vmul.f32 0.5, %v310_v14 }
 0x16c   : > { %551 = verf.f32 %v314_v16 }
 0x179   : > { %v552_v17 = vpop.eup %551 }
 0x17a   : > { %v316_v19 = vadd.f32 1.0, %v552_v17 }
 0x17c   : > { %v317_v20 = vmul.f32 %v316_v19, %v313_v18 }
 0x17e   : > { %508 = vmatmul.mubr.msk.f32.vlgmr.msra.gmra.mxu1 %vm320_vm4, %v317_v20 }
 0x23e   : > { %v390_v22 = vpop.f32.mrf.mxu1 }
 0x23f   : > { %v391_v23 = vadd.f32 %v390_v22, %v319_v21 }
 0x240   : > { %v509_v24 = vpop.f32.mrf.mxu1 }
 0x241   : > { %v491_v25 = vmul.f32 -1.442695, %v391_v23 }
 0x243   : > { %553 = vpow2.f32 %v491_v25 }
 0x250   : > { %v554_v26 = vpop.eup %553 }
 0x251   : > { %v397_v27 = vadd.f32 1.0, %v554_v26 }
 0x253   : > { %555 = vrcp.f32 %v397_v27 }
 0x260   : > { %v556_v29 = vpop.eup %555 }
 0x261   : > { %v403_v30 = vrot.slane %v556_v29, %v402_v28 }
 0x263   : > { %405 = vbcast.lane.b32.xlu0 %v403_v30, 256 }
 0x2d5   : > { %v406_v31 = vpop.permute.xlu0 %405 }
 0x2d6   : > { %v407_v32 = vmul.f32 %v406_v31, %v220_v0 }
 0x2d8   : > { %408 = vst.msk [vmem:[%s215_s30] sm:$0xf] %vm221_vm0, %v407_v32 }
 0x2d9   : > { %570 = shalt.err (!%p567_p3)
}
 0x2da   : > { %s571_s14 = scalar_lea.hbm %s421_s9, 64  ;;  %s575_s17 = scalar_lea.hbm %s758_s5, 128 }
 0x2db   : > { %p572_p4 = scmp.ne.s32.totalorder %s421_s9, %s571_s14  ;;  %p576_p9 = scmp.lt.s32.totalorder %s421_s9, %s758_s5 }
 0x2dc   : > { %p577_p10 = scmp.lt.s32.totalorder %s575_s17, %s571_s14 }
 0x2dd   : > { %p573_p7 = pnand %p572_p4, %p690_p5 }
 0x2de   : > { %p578_p11 = por %p577_p10, %p576_p9 }
 0x2df   : > { %p574_p8 = pneg %p573_p7 }
 0x2e1   : > { %p579_p12 = pnand %p578_p11, %p574_p8 }
 0x2e3   : > { %582 = shalt.err (!%p579_p12)
}
 0x2e4   : > { %510 = dma.vmem_to_hbm [thread:$0]  (%p690_p5), %s424_s6, 64, %s421_s9, %s410_s10  }
 0x2e5 PF: > { %p516_p13 = scmp.ge.s32.totalorder %s617_s21, 2  ;;  %s435_s26 = sand.u32 1, %s605_s18  }
 0x2e6   : > { %s436_s30 = scalar_lea.sflag [#allocation3], %s435_s26 }
 0x2e7   : > { %p513_p0 = pnand %p516_p13, %p694_p6 }
 0x2e9   : > { %p514_p1 = pneg %p513_p0 }
 0x2eb   : > { %600 = dma.done.wait (%p514_p1), %s436_s30, 64  }
 0x2ec   : > { %602 = vsyncadd (%p514_p1), %s436_s30, 4294967232  ;;  %p15_p2 = scmp.ge.s32.totalorder %s677_s24, 4   ;;  %s761_s18 = smov %s609_s19 }
 0x2ed   : > { %s762_s19 = smov %s613_s20  ;;  %s763_s20 = smov %s688_s27 }
 0x2ee   : > { %s764_s21 = smov %s677_s24  ;;  %17 = sbr.rel (!%p15_p2) target bundleno = 3 (0x3), region = 75 }
 0x2f3   :  { %441 = vsyncpa [#allocation3], 1 }
 0x2f4   :  { %443 = vsyncpa [#allocation3 + $0x1], 1 }

</bundles_post_ra>
